<compile_context>
chip_gen: v7x
topology: tpu7x:2x2x1
jax: 0.10.0
libtpu: 0.0.40
codegen_flags: <defaults>
</compile_context>

<pallas_src>
import jax
import jax.numpy as jnp
from jax.experimental import pallas as pl
from jax.experimental.pallas import tpu as pltpu

_MIB = 1024 * 1024


def _bias_kernel(alpha_ref, beta_ref, x_ref, o_ref):
    # alpha_ref / beta_ref: SMEM (1,) f32 scalars.
    alpha = alpha_ref[0]
    beta = beta_ref[0]
    xf = x_ref[...].astype(jnp.float32)          # in-kernel upcast (free, VPU)
    o_ref[...] = (alpha * xf + beta).astype(o_ref.dtype)


def _vmem_capacity_bytes():
    try:
        return int(pltpu.get_tpu_info().vmem_capacity_bytes)
    except Exception:
        return 64 * _MIB  # conservative (v7x-sized) default


def _xla_bias(x, alpha_f, beta_f, dtype, orig_shape):
    # Fused XLA elementwise: 2 HBM passes, already at the roofline for this op.
    return (alpha_f[0] * x.astype(jnp.float32) + beta_f[0]).astype(dtype).reshape(orig_shape)


def bias_layer_forward(x, alpha, beta, *, min_pallas_bytes=256 * 1024):
    """alpha * x + beta with alpha, beta scalar parameters of shape (1,)."""
    orig_shape = x.shape
    dtype = x.dtype
    n = x.size
    itemsize = jnp.dtype(dtype).itemsize

    alpha_f = alpha.reshape(-1).astype(jnp.float32)
    beta_f = beta.reshape(-1).astype(jnp.float32)

    # Tiny tensors (BiC feeds this layer small logit tensors): kernel launch +
    # pipeline prologue dominate -> plain XLA is strictly faster.
    if n * itemsize < min_pallas_bytes:
        return _xla_bias(x, alpha_f, beta_f, dtype, orig_shape)

    # Widest lane dim (multiple of 128) that divides the flat size exactly.
    lanes = None
    for cand in (4096, 2048, 1024, 512, 256, 128):
        if n % cand == 0:
            lanes = cand
            break
    if lanes is None:
        # Ragged flat size: padding/slicing around a kernel would add whole
        # extra HBM passes; fused XLA is already optimal (2 passes).
        # TODO(synk): in-kernel lane-masked tail store would let ragged sizes
        # use the Pallas path without extra HBM traffic.
        return _xla_bias(x, alpha_f, beta_f, dtype, orig_shape)

    rows = n // lanes
    x2d = x.reshape(rows, lanes)

    # --- Generation-aware block sizing --------------------------------------
    vmem_cap = _vmem_capacity_bytes()
    # ~vmem/8 per block: v7x (64 MiB) -> 8 MiB, v5e/v6e (128 MiB) -> 16 MiB.
    target_block_bytes = min(16 * _MIB, max(4 * _MIB, vmem_cap // 8))

    # Dtype-dependent sublane multiple for the second-to-last block dim.
    sublane = {4: 8, 2: 16, 1: 32}.get(itemsize, 8)
    bytes_per_row = lanes * itemsize
    row_tile = max(sublane, (target_block_bytes // bytes_per_row) // sublane * sublane)

    # Guarantee >= 2 grid steps when there is enough work so the "parallel"
    # axis can shard across both TensorCores on v7x.
    if rows > 2 * sublane:
        half_rounded = pl.cdiv(pl.cdiv(rows, 2), sublane) * sublane
        row_tile = min(row_tile, half_rounded)
    if row_tile >= rows:
        row_tile = rows  # full extent: always a legal block dim

    grid = (pl.cdiv(rows, row_tile),)

    # in + out, double-buffered => 4x block bytes must fit, plus headroom.
    block_bytes = row_tile * bytes_per_row
    vmem_limit = int(min(vmem_cap * 3 // 4, 4 * block_bytes + 8 * _MIB))

    out2d = pl.pallas_call(
        _bias_kernel,
        out_shape=jax.ShapeDtypeStruct((rows, lanes), dtype),
        grid_spec=pltpu.PrefetchScalarGridSpec(
            num_scalar_prefetch=0,
            grid=grid,
            in_specs=[
                pl.BlockSpec(memory_space=pltpu.MemorySpace.SMEM),   # alpha
                pl.BlockSpec(memory_space=pltpu.MemorySpace.SMEM),   # beta
                pl.BlockSpec((row_tile, lanes), lambda i: (i, 0)),
            ],
            out_specs=pl.BlockSpec((row_tile, lanes), lambda i: (i, 0)),
        ),
        compiler_params=pltpu.CompilerParams(
            dimension_semantics=("parallel",),
            vmem_limit_bytes=vmem_limit,
        ),
        cost_estimate=pl.CostEstimate(
            flops=2 * n, transcendentals=0, bytes_accessed=2 * n * itemsize
        ),
    )(alpha_f, beta_f, x2d)

    return out2d.reshape(orig_shape)


if __name__ == "__main__":
    key = jax.random.PRNGKey(0)

    # BiasLayer init is alpha=1, beta=0; perturb so the op is nontrivial but
    # still deterministic.
    alpha = jnp.ones((1,), dtype=jnp.float32) * 1.5
    beta = jnp.zeros((1,), dtype=jnp.float32) + 0.25

    # Small NCHW-style input. Force the Pallas path (the default threshold
    # would route such a tiny tensor to the XLA fallback).
    x = jax.random.normal(key, (2, 4, 16, 16), dtype=jnp.float32)
    out = jax.block_until_ready(bias_layer_forward(x, alpha, beta, min_pallas_bytes=0))
    ref = alpha[0] * x + beta[0]
    assert out.shape == x.shape
    assert out.dtype == x.dtype
    assert jnp.allclose(out, ref, atol=1e-6, rtol=1e-6)

    # bf16 input through the Pallas path (exercises dtype-aware sublane tiling).
    xb = jax.random.normal(jax.random.PRNGKey(1), (4, 8, 32), dtype=jnp.bfloat16)
    outb = jax.block_until_ready(bias_layer_forward(xb, alpha, beta, min_pallas_bytes=0))
    refb = (alpha[0] * xb.astype(jnp.float32) + beta[0]).astype(jnp.bfloat16)
    assert outb.shape == xb.shape and outb.dtype == jnp.bfloat16
    assert jnp.allclose(outb.astype(jnp.float32), refb.astype(jnp.float32),
                        atol=1e-2, rtol=1e-2)

    # Ragged / tiny path (plain-XLA fallback) still matches the reference.
    x2 = jax.random.normal(jax.random.PRNGKey(2), (3, 5, 7), dtype=jnp.float32)
    out2 = jax.block_until_ready(bias_layer_forward(x2, alpha, beta))
    ref2 = alpha[0] * x2 + beta[0]
    assert out2.shape == x2.shape
    assert jnp.allclose(out2, ref2, atol=1e-6, rtol=1e-6)

    print("KERNEL_OK")
</pallas_src>

<mosaic_0001>
module attributes {stable_mosaic.version = 11 : i64} {
  func.func @_bias_kernel(%arg0: i32, %arg1: memref<1xf32, #tpu.memory_space<smem>>, %arg2: memref<1xf32, #tpu.memory_space<smem>>, %arg3: memref<1x2048xf32, #tpu.memory_space<vmem>>, %arg4: memref<1x2048xf32, #tpu.memory_space<vmem>>) attributes {dimension_semantics = [#tpu.dimension_semantics<parallel>], iteration_bounds = array<i64: 1>, scalar_prefetch = 0 : i64, scratch_operands = 0 : i64, tpu.core_type = #tpu.core_type<tc>, window_params = [{transform_indices = @transform_0, window_bounds = array<i64: 1>}, {transform_indices = @transform_1, window_bounds = array<i64: 1>}, {transform_indices = @transform_2, window_bounds = array<i64: 1, 2048>}, {transform_indices = @transform_3, window_bounds = array<i64: 1, 2048>}]} {
    %c0 = arith.constant 0 : index
    %0 = memref.load %arg1[%c0] : memref<1xf32, #tpu.memory_space<smem>>
    %c0_0 = arith.constant 0 : index
    %1 = memref.load %arg2[%c0_0] : memref<1xf32, #tpu.memory_space<smem>>
    %c0_1 = arith.constant 0 : index
    %c0_2 = arith.constant 0 : index
    %2 = vector.load %arg3[%c0_1, %c0_2] : memref<1x2048xf32, #tpu.memory_space<vmem>>, vector<1x2048xf32>
    %3 = vector.broadcast %0 : f32 to vector<1x2048xf32>
    %4 = arith.mulf %3, %2 : vector<1x2048xf32>
    %5 = vector.broadcast %1 : f32 to vector<1x2048xf32>
    %6 = arith.addf %4, %5 : vector<1x2048xf32>
    %c0_3 = arith.constant 0 : index
    %c0_4 = arith.constant 0 : index
    %7 = vector.load %arg4[%c0_3, %c0_4] : memref<1x2048xf32, #tpu.memory_space<vmem>>, vector<1x2048xf32>
    tpu.vector_store %arg4[%c0_3, %c0_4], %6 {strides = array<i32>} : memref<1x2048xf32, #tpu.memory_space<vmem>>, vector<1x2048xf32>,
    return
  }
  func.func @transform_0(%arg0: i32) -> i32 {
    %c0_i32 = arith.constant 0 : i32
    %c0_i32_0 = arith.constant 0 : i32
    return %c0_i32 : i32
  }
  func.func @transform_1(%arg0: i32) -> i32 {
    %c0_i32 = arith.constant 0 : i32
    %c0_i32_0 = arith.constant 0 : i32
    return %c0_i32 : i32
  }
  func.func @transform_2(%arg0: i32) -> (i32, i32) {
    %c0_i32 = arith.constant 0 : i32
    %c0_i32_0 = arith.constant 0 : i32
    return %arg0, %c0_i32 : i32, i32
  }
  func.func @transform_3(%arg0: i32) -> (i32, i32) {
    %c0_i32 = arith.constant 0 : i32
    %c0_i32_0 = arith.constant 0 : i32
    return %arg0, %c0_i32 : i32, i32
  }
}

</mosaic_0001>

<bundles_post_ra>
// kernel: tpu_custom_call.1
= control target key start
LH: loop header
LB: loop body
LE: loop exit
PB: predicated region body
PF: predicated region fallthrough
CT: control target
= control target key end

     0   :  { %10 = vsyncpa [#allocation5], 0  ;;  %s158_s0 = inlined_call_operand.<no memory space> [shape: f32[1], index: 0, kind: input, shape index: {}]   ;;  %s159_s1 = inlined_call_operand.<no memory space> [shape: f32[1], index: 1, kind: input, shape index: {}]   ;;  %s160_s2 = inlined_call_operand.hbm [shape: f32[1,2048], index: 2, kind: input, shape index: {}]   ;;  %s161_s3 = inlined_call_operand.hbm [shape: f32[1,2048], index: 3, kind: output, shape index: {}]  }
   0x1   :  { %11 = vsyncpa [#allocation6], 0  ;;  %s106_s12 = smov [#allocation4]   ;;  %s58_s16 = scalar_lea.hbm %s160_s2, 256 }
   0x2   :  { %s22_s13 = sshll.u32 %s106_s12, 4  ;;  %p59_p0 = scmp.ne.s32.totalorder %s160_s2, %s58_s16  ;;  %s23_s13 = int_to_ptr.vmem [resolvable:$true] %s22_s13 }
   0x3   :  { %p62_p1 = scmp.lt.u32.totalorder %s58_s16, %s160_s2 }
   0x5   :  { %p64_p2 = pnand %p62_p1, %p59_p0 }
   0x7   :  { %67 = shalt.err (!%p64_p2)
}
   0x8   :  { %s68_s21 = scalar_lea.vmem %s23_s13, 256  ;;  %p73_p4 = scmp.lt.s32.totalorder %s23_s13, %s23_s13 }
   0x9   :  { %p69_p3 = scmp.ne.s32.totalorder %s23_s13, %s68_s21  ;;  %p74_p5 = scmp.lt.s32.totalorder %s68_s21, %s68_s21 }
   0xb   :  { %p75_p6 = por %p74_p5, %p73_p4 }
   0xd   :  { %p76_p7 = pnand %p75_p6, %p69_p3 }
   0xf   :  { %79 = shalt.err (!%p76_p7)
}
  0x10   :  { %25 = dma.hbm_to_vmem [thread:$0]  %s160_s2, 256, %s23_s13, [#allocation5]  }
  0x11   :  { %102 = dma.done.wait [#allocation5], 256  }
  0x12   :  { %103 = vsyncadd [#allocation5], 4294967040  ;;  %v33_v0 = vstv %s158_s0  ;;  %v31_v1 = vld [vmem:[#allocation4] sm:$0xff]  ;;  %v36_v2 = vstv %s159_s1  ;;  %v32_v3 = vld [vmem:[#allocation4 + $0x8] sm:$0xff]  ;;  %s107_s28 = smov [#allocation7]  }
  0x13   :  { %s47_s29 = sshll.u32 %s107_s28, 4  ;;  %v34_v4 = vmul.f32 %v33_v0, %v31_v1  ;;  %v35_v5 = vmul.f32 %v33_v0, %v32_v3  ;;  %s48_s29 = int_to_ptr.vmem [resolvable:$true] %s47_s29 }
  0x14   :  { %s80_s2 = scalar_lea.vmem %s48_s29, 256  ;;  %p85_p9 = scmp.lt.s32.totalorder %s48_s29, %s48_s29 }
  0x15   :  { %v37_v6 = vadd.f32 %v36_v2, %v34_v4  ;;  %v38_v7 = vadd.f32 %v36_v2, %v35_v5  ;;  %p81_p8 = scmp.ne.s32.totalorder %s48_s29, %s80_s2  ;;  %p86_p10 = scmp.lt.s32.totalorder %s80_s2, %s80_s2 }
  0x17   :  { %39 = vst [vmem:[#allocation7] sm:$0xff] %v37_v6  ;;  %40 = vst [vmem:[#allocation7 + $0x8] sm:$0xff] %v38_v7  ;;  %p87_p11 = por %p86_p10, %p85_p9 }
  0x19   :  { %p88_p12 = pnand %p87_p11, %p81_p8 }
  0x1b   :  { %91 = shalt.err (!%p88_p12)
}
  0x1c   :  { %s92_s1 = scalar_lea.hbm %s161_s3, 256 }
  0x1d   :  { %p93_p13 = scmp.ne.s32.totalorder %s161_s3, %s92_s1  ;;  %p96_p0 = scmp.lt.u32.totalorder %s92_s1, %s161_s3 }
  0x1f   :  { %p98_p1 = pnand %p96_p0, %p93_p13 }
  0x21   :  { %101 = shalt.err (!%p98_p1)
}
  0x22   :  { %50 = dma.vmem_to_hbm [thread:$0]  %s48_s29, 256, %s161_s3, [#allocation6]  }
  0x23   :  { %104 = dma.done.wait [#allocation6], 256  }
  0x24   :  { %105 = vsyncadd [#allocation6], 4294967040 }
  0x25   :  { %54 = vsyncpa [#allocation5], 1 }
  0x26   :  { %55 = vsyncpa [#allocation6], 1 }

</bundles_post_ra>
